<compile_context>
chip_gen: v7x
topology: tpu7x:2x2x1
jax: 0.10.0
libtpu: 0.0.40
codegen_flags: <defaults>
</compile_context>

<pallas_src>
import functools

import jax
import jax.numpy as jnp
from jax.experimental import pallas as pl
from jax.experimental.pallas import tpu as pltpu


# Grid-invariant weights are fetched once; a single buffer suffices.
_WEIGHT_BUFFER_COUNT = 1


# ----------------------------- Pallas kernels ------------------------------

def _encode(x_f32, w1_ref, b1_ref, w2_ref, b2_ref, out_ref):
    """Shared 2-layer MLP encoder: Linear -> ReLU -> Linear -> ReLU.

    Matmul operands are cast to the weights' dtype (bf16 by default) right
    before each dot; accumulation is f32 (preferred_element_type).  Biases f32.
    """
    w1 = w1_ref[...]
    w2 = w2_ref[...]
    cd = w1.dtype

    h = jnp.dot(x_f32.astype(cd), w1, preferred_element_type=jnp.float32)
    h = jnp.maximum(h + b1_ref[...], 0.0)

    o = jnp.dot(h.astype(cd), w2, preferred_element_type=jnp.float32)
    o = jnp.maximum(o + b2_ref[...], 0.0)

    out_ref[...] = o.astype(out_ref.dtype)


def _ray_kernel(rays_ref, w1_ref, b1_ref, w2_ref, b2_ref, out_ref, *,
                norm_method, maximum_ray_length, approx):
    """'none' / 'invert' / 'max' normalization + encoder, fully in VMEM."""
    rays = rays_ref[...].astype(jnp.float32)

    if norm_method == "none":
        x = rays
    elif norm_method == "invert":
        denom = 1.0 + rays
        x = pl.reciprocal(denom, approx=True) if approx else 1.0 / denom
    elif norm_method == "max":
        # constant reciprocal -> single VPU multiply (<= 1 ulp from a true divide)
        x = rays * (1.0 / maximum_ray_length)
    else:
        raise ValueError(f"Unknown normalization method {norm_method}")

    _encode(x, w1_ref, b1_ref, w2_ref, b2_ref, out_ref)


def _ray_goal_kernel(rays_ref, goal_ref, w1_ref, b1_ref, w2_ref, b2_ref,
                     out_ref, *, approx):
    """'goal' normalization: rays * (1 / goal_dist), goal broadcast over lanes.

    The reciprocal is taken on the (bm, 1) goal column (EUP) and broadcast, not
    a full (bm, N) divide.  Ragged (out-of-bounds) rows may produce inf/NaN but
    their stores are discarded by Pallas.
    """
    rays = rays_ref[...].astype(jnp.float32)
    goal = goal_ref[...].astype(jnp.float32)            # (bm, 1)
    inv_goal = pl.reciprocal(goal, approx=True) if approx else 1.0 / goal
    x = rays * inv_goal                                  # (bm,1) -> (bm,N)
    _encode(x, w1_ref, b1_ref, w2_ref, b2_ref, out_ref)


# ------------------------------ Python wrapper ------------------------------

def prepare_ray_encoder_params(params, compute_dtype=jnp.bfloat16):
    """Hoist the MXU-operand cast out of the forward path (do it once at model
    build time).  Biases stay f32 (added to the f32 accumulator)."""
    return {
        "w1": jnp.asarray(params["w1"], compute_dtype),
        "b1": jnp.asarray(params["b1"], jnp.float32),
        "w2": jnp.asarray(params["w2"], compute_dtype),
        "b2": jnp.asarray(params["b2"], jnp.float32),
    }


def _max_bm_for_device():
    """Cap the batch tile at 256 on v5e (single vector-store slot, ~820 GB/s
    HBM); 512 on newer generations."""
    try:
        kind = jax.devices()[0].device_kind.lower()
    except Exception:
        return 512
    if "v5 lite" in kind or "v5e" in kind or "v5litepod" in kind:
        return 256
    return 512


def _pick_bm(B, max_bm):
    """Batch-tile heuristic.  Small batches: one full block.  Large batches:
    bm = clamp(round_up(B//4, 8), 128, max_bm), so the grid has >= 2 (usually
    >= 4) steps -> DMA/compute pipelining + v7x dual-TensorCore sharding."""
    if B < 128:
        return B
    bm = ((B // 4 + 7) // 8) * 8
    return max(128, min(max_bm, bm))


def _vmem_limit_bytes(bm, N, H, O, rays_isz, out_isz, w_isz, has_goal):
    """Conservative per-step VMEM footprint (lane/sublane tile padding included),
    floored at the 32 MiB scoped default and capped at v7x's 64 MiB physical."""
    lane = lambda d: ((d + 127) // 128) * 128
    sub = lambda d: ((d + 7) // 8) * 8
    blocks = 2 * bm * lane(N) * rays_isz + 2 * bm * lane(O) * out_isz
    if has_goal:
        blocks += 2 * bm * 128 * 4
    weights = _WEIGHT_BUFFER_COUNT * (
        (sub(N) * lane(H) + sub(H) * lane(O)) * w_isz
        + (8 * lane(H) + 8 * lane(O)) * 4)
    interm = 4 * bm * (lane(N) + lane(H) + lane(O)) * 4     # f32 temporaries
    est = blocks + weights + interm + (2 << 20)
    return int(max(32 << 20, min(64 << 20, 2 * est)))


def ray_network_forward(rays, params, *, norm_method="invert",
                        maximum_ray_length=10.0, goal_dist=None,
                        bm=None, compute_dtype=jnp.bfloat16,
                        approx_reciprocal=None, out_dtype=jnp.float32):
    """rays: (B, N) float32/bfloat16.  params: w1 (N,H), b1 (1,H), w2 (H,O), b2 (1,O).

    Returns (B, O) in out_dtype — no wrapper padding or slicing.  Pass params
    through prepare_ray_encoder_params once at build time to make the per-call
    weight casts no-ops.
    """
    B, N = rays.shape
    # No-op casts when params were prepared with the same compute_dtype.
    w1 = jnp.asarray(params["w1"], compute_dtype)
    w2 = jnp.asarray(params["w2"], compute_dtype)
    b1 = jnp.asarray(params["b1"], jnp.float32).reshape(1, -1)
    b2 = jnp.asarray(params["b2"], jnp.float32).reshape(1, -1)
    H = w1.shape[1]
    O = w2.shape[1]

    if approx_reciprocal is None:
        approx_reciprocal = jnp.dtype(compute_dtype) == jnp.dtype(jnp.bfloat16)

    if bm is None:
        bm = _pick_bm(B, _max_bm_for_device())
    if bm >= B:
        bm = B                       # single full-batch block (full-dim exception)
    else:
        bm = max(8, (bm // 8) * 8)   # ragged last block needs sublane-aligned bm

    # Ragged last block: Pallas discards out-of-bounds stores, so no batch pad.
    grid = (pl.cdiv(B, bm),)

    rays_spec = pl.BlockSpec((bm, N), lambda i: (i, 0))
    out_spec = pl.BlockSpec((bm, O), lambda i: (i, 0))

    def _wspec(shape):
        # Grid-invariant block (constant index_map) -> resident across the grid;
        # single buffer since it is only fetched once.
        return pl.BlockSpec(shape, lambda i: (0, 0),
                            pipeline_mode=pl.Buffered(_WEIGHT_BUFFER_COUNT))

    weight_specs = [_wspec((N, H)), _wspec((1, H)), _wspec((H, O)), _wspec((1, O))]

    if norm_method == "goal":
        if goal_dist is None:
            raise ValueError("Goal distance cannot be None when using goal normalization")
        goal_dist = goal_dist.reshape(B, 1)
        kernel = functools.partial(_ray_goal_kernel, approx=approx_reciprocal)
        in_specs = [rays_spec, pl.BlockSpec((bm, 1), lambda i: (i, 0))] + weight_specs
        operands = (rays, goal_dist, w1, b1, w2, b2)
        transcendentals = B
    elif norm_method in ("none", "invert", "max"):
        kernel = functools.partial(_ray_kernel, norm_method=norm_method,
                                   maximum_ray_length=maximum_ray_length,
                                   approx=approx_reciprocal)
        in_specs = [rays_spec] + weight_specs
        operands = (rays, w1, b1, w2, b2)
        transcendentals = B * N if norm_method == "invert" else 0
    else:
        # TODO(synk): 'lin_sigm_robot_radius' needs StateNetwork.normalize_linear_sigmoid.
        raise ValueError(f"Unknown normalization method {norm_method}")

    w_isz = jnp.dtype(compute_dtype).itemsize
    out_isz = jnp.dtype(out_dtype).itemsize
    cost = pl.CostEstimate(
        flops=2 * B * (N * H + H * O),
        transcendentals=int(transcendentals),
        bytes_accessed=int(B * N * rays.dtype.itemsize
                           + (N * H + H * O) * w_isz + (H + O) * 4
                           + B * O * out_isz
                           + (B * 4 if norm_method == "goal" else 0)),
    )

    return pl.pallas_call(
        kernel,
        out_shape=jax.ShapeDtypeStruct((B, O), out_dtype),
        grid_spec=pltpu.PrefetchScalarGridSpec(
            num_scalar_prefetch=0,
            grid=grid,
            in_specs=in_specs,
            out_specs=out_spec,
        ),
        compiler_params=pltpu.CompilerParams(
            dimension_semantics=("parallel",),
            vmem_limit_bytes=_vmem_limit_bytes(
                bm, N, H, O, rays.dtype.itemsize, out_isz, w_isz,
                norm_method == "goal"),
        ),
        cost_estimate=cost,
    )(*operands)


# ------------------------------- reference ----------------------------------

def ray_network_reference(rays, params, *, norm_method="invert",
                          maximum_ray_length=10.0, goal_dist=None):
    if norm_method == "none":
        x = rays
    elif norm_method == "invert":
        x = 1.0 / (1.0 + rays)
    elif norm_method == "max":
        x = rays / maximum_ray_length
    elif norm_method == "goal":
        x = rays / goal_dist
    else:
        raise ValueError(norm_method)
    h = jnp.maximum(x @ params["w1"] + params["b1"], 0.0)
    return jnp.maximum(h @ params["w2"] + params["b2"], 0.0)


# --------------------------------- main --------------------------------------

if __name__ == "__main__":
    B, N_RAYS, HIDDEN, OUT = 16, 256, 128, 64

    key = jax.random.PRNGKey(0)
    k_rays, k_goal, k_w1, k_w2, k_rag = jax.random.split(key, 5)

    # rays are distances in [0, maximum_ray_length]
    rays = jax.random.uniform(k_rays, (B, N_RAYS), jnp.float32,
                              minval=0.0, maxval=10.0)
    goal_dist = jax.random.uniform(k_goal, (B, 1), jnp.float32,
                                   minval=1.0, maxval=5.0)

    params_f32 = {
        "w1": jax.random.normal(k_w1, (N_RAYS, HIDDEN), jnp.float32) * 0.05,
        "b1": jnp.full((1, HIDDEN), 0.01, jnp.float32),
        "w2": jax.random.normal(k_w2, (HIDDEN, OUT), jnp.float32) * 0.05,
        "b2": jnp.full((1, OUT), 0.01, jnp.float32),
    }
    # One-time (build-time) cast of MXU operands — hoisted out of the forward path.
    params_bf16 = prepare_ray_encoder_params(params_f32, jnp.bfloat16)

    # ---- 'invert' normalization ----
    ref = ray_network_reference(rays, params_f32, norm_method="invert",
                                maximum_ray_length=10.0)

    # exact path: f32 matmul operands + exact reciprocal
    out_f32 = jax.block_until_ready(ray_network_forward(
        rays, params_f32, norm_method="invert", maximum_ray_length=10.0,
        compute_dtype=jnp.float32))
    assert out_f32.shape == (B, OUT)
    assert jnp.allclose(out_f32, ref, atol=1e-4, rtol=1e-4)

    # default fast path: bf16 MXU operands (f32 accumulation) + approx reciprocal
    out_bf16 = jax.block_until_ready(ray_network_forward(
        rays, params_bf16, norm_method="invert", maximum_ray_length=10.0))
    assert out_bf16.shape == (B, OUT)
    assert jnp.allclose(out_bf16, ref, atol=5e-2, rtol=5e-2)

    # ---- 'goal' normalization ----
    ref_goal = ray_network_reference(rays, params_f32, norm_method="goal",
                                     goal_dist=goal_dist)
    out_goal = jax.block_until_ready(ray_network_forward(
        rays, params_bf16, norm_method="goal", goal_dist=goal_dist))
    assert jnp.allclose(out_goal, ref_goal, atol=5e-2, rtol=5e-2)

    # ---- 'max' normalization ----
    ref_max = ray_network_reference(rays, params_f32, norm_method="max",
                                    maximum_ray_length=10.0)
    out_max = jax.block_until_ready(ray_network_forward(
        rays, params_bf16, norm_method="max", maximum_ray_length=10.0))
    assert jnp.allclose(out_max, ref_max, atol=5e-2, rtol=5e-2)

    # ---- ragged multi-step grid (exercises cdiv grid + discarded OOB stores) ----
    B2 = 20
    rays2 = jax.random.uniform(k_rag, (B2, N_RAYS), jnp.float32,
                               minval=0.0, maxval=10.0)
    ref2 = ray_network_reference(rays2, params_f32, norm_method="invert",
                                 maximum_ray_length=10.0)
    out2 = jax.block_until_ready(ray_network_forward(
        rays2, params_bf16, norm_method="invert", maximum_ray_length=10.0, bm=8))
    assert out2.shape == (B2, OUT)
    assert jnp.allclose(out2, ref2, atol=5e-2, rtol=5e-2)

    print("KERNEL_OK")
</pallas_src>

<mosaic_0001>
module attributes {stable_mosaic.version = 11 : i64} {
  func.func @_ray_kernel(%arg0: i32, %arg1: memref<16x256xf32, #tpu.memory_space<vmem>>, %arg2: memref<256x128xf32, #tpu.memory_space<vmem>>, %arg3: memref<1x128xf32, #tpu.memory_space<vmem>>, %arg4: memref<128x64xf32, #tpu.memory_space<vmem>>, %arg5: memref<1x64xf32, #tpu.memory_space<vmem>>, %arg6: memref<16x64xf32, #tpu.memory_space<vmem>>) attributes {dimension_semantics = [#tpu.dimension_semantics<parallel>], iteration_bounds = array<i64: 1>, scalar_prefetch = 0 : i64, scratch_operands = 0 : i64, tpu.core_type = #tpu.core_type<tc>, window_params = [{transform_indices = @transform_0, window_bounds = array<i64: 16, 256>}, {pipeline_mode = #tpu.pipeline_mode<synchronous>, transform_indices = @transform_1, window_bounds = array<i64: 256, 128>}, {pipeline_mode = #tpu.pipeline_mode<synchronous>, transform_indices = @transform_2, window_bounds = array<i64: 1, 128>}, {pipeline_mode = #tpu.pipeline_mode<synchronous>, transform_indices = @transform_3, window_bounds = array<i64: 128, 64>}, {pipeline_mode = #tpu.pipeline_mode<synchronous>, transform_indices = @transform_4, window_bounds = array<i64: 1, 64>}, {transform_indices = @transform_5, window_bounds = array<i64: 16, 64>}]} {
    %c0 = arith.constant 0 : index
    %c0_0 = arith.constant 0 : index
    %0 = vector.load %arg1[%c0, %c0_0] : memref<16x256xf32, #tpu.memory_space<vmem>>, vector<16x256xf32>
    %cst = arith.constant 1.000000e+00 : f32
    %1 = vector.broadcast %cst : f32 to vector<16x256xf32>
    %2 = arith.addf %1, %0 : vector<16x256xf32>
    %cst_1 = arith.constant 1.000000e+00 : f32
    %3 = vector.broadcast %cst_1 : f32 to vector<16x256xf32>
    %4 = arith.divf %3, %2 : vector<16x256xf32>
    %c0_2 = arith.constant 0 : index
    %c0_3 = arith.constant 0 : index
    %5 = vector.load %arg2[%c0_2, %c0_3] : memref<256x128xf32, #tpu.memory_space<vmem>>, vector<256x128xf32>
    %c0_4 = arith.constant 0 : index
    %c0_5 = arith.constant 0 : index
    %6 = vector.load %arg4[%c0_4, %c0_5] : memref<128x64xf32, #tpu.memory_space<vmem>>, vector<128x64xf32>
    %cst_6 = arith.constant dense<0.000000e+00> : vector<16x128xf32>
    %7 = tpu.matmul %4, %5, %cst_6 {dimension_numbers = #tpu.dot_dimension_numbers<[1], [0], [0], [1], [0, 0, 1, 1], [], []>} : vector<16x256xf32>, vector<256x128xf32>, vector<16x128xf32> -> vector<16x128xf32>
    %c0_7 = arith.constant 0 : index
    %c0_8 = arith.constant 0 : index
    %8 = vector.load %arg3[%c0_7, %c0_8] : memref<1x128xf32, #tpu.memory_space<vmem>>, vector<1x128xf32>
    %9 = vector.broadcast %8 : vector<1x128xf32> to vector<16x128xf32>
    %10 = arith.addf %7, %9 : vector<16x128xf32>
    %cst_9 = arith.constant 0.000000e+00 : f32
    %11 = vector.broadcast %cst_9 : f32 to vector<16x128xf32>
    %12 = arith.maximumf %10, %11 : vector<16x128xf32>
    %cst_10 = arith.constant dense<0.000000e+00> : vector<16x64xf32>
    %13 = tpu.matmul %12, %6, %cst_10 {dimension_numbers = #tpu.dot_dimension_numbers<[1], [0], [0], [1], [0, 0, 1, 1], [], []>} : vector<16x128xf32>, vector<128x64xf32>, vector<16x64xf32> -> vector<16x64xf32>
    %c0_11 = arith.constant 0 : index
    %c0_12 = arith.constant 0 : index
    %14 = vector.load %arg5[%c0_11, %c0_12] : memref<1x64xf32, #tpu.memory_space<vmem>>, vector<1x64xf32>
    %15 = vector.broadcast %14 : vector<1x64xf32> to vector<16x64xf32>
    %16 = arith.addf %13, %15 : vector<16x64xf32>
    %cst_13 = arith.constant 0.000000e+00 : f32
    %17 = vector.broadcast %cst_13 : f32 to vector<16x64xf32>
    %18 = arith.maximumf %16, %17 : vector<16x64xf32>
    %c0_14 = arith.constant 0 : index
    %c0_15 = arith.constant 0 : index
    %19 = vector.load %arg6[%c0_14, %c0_15] : memref<16x64xf32, #tpu.memory_space<vmem>>, vector<16x64xf32>
    tpu.vector_store %arg6[%c0_14, %c0_15], %18 {strides = array<i32>} : memref<16x64xf32, #tpu.memory_space<vmem>>, vector<16x64xf32>,
    return
  }
  func.func @transform_0(%arg0: i32) -> (i32, i32) {
    %c0_i32 = arith.constant 0 : i32
    %c0_i32_0 = arith.constant 0 : i32
    return %arg0, %c0_i32 : i32, i32
  }
  func.func @transform_1(%arg0: i32) -> (i32, i32) {
    %c0_i32 = arith.constant 0 : i32
    %c0_i32_0 = arith.constant 0 : i32
    %c0_i32_1 = arith.constant 0 : i32
    return %c0_i32, %c0_i32_0 : i32, i32
  }
  func.func @transform_2(%arg0: i32) -> (i32, i32) {
    %c0_i32 = arith.constant 0 : i32
    %c0_i32_0 = arith.constant 0 : i32
    %c0_i32_1 = arith.constant 0 : i32
    return %c0_i32, %c0_i32_0 : i32, i32
  }
  func.func @transform_3(%arg0: i32) -> (i32, i32) {
    %c0_i32 = arith.constant 0 : i32
    %c0_i32_0 = arith.constant 0 : i32
    %c0_i32_1 = arith.constant 0 : i32
    return %c0_i32, %c0_i32_0 : i32, i32
  }
  func.func @transform_4(%arg0: i32) -> (i32, i32) {
    %c0_i32 = arith.constant 0 : i32
    %c0_i32_0 = arith.constant 0 : i32
    %c0_i32_1 = arith.constant 0 : i32
    return %c0_i32, %c0_i32_0 : i32, i32
  }
  func.func @transform_5(%arg0: i32) -> (i32, i32) {
    %c0_i32 = arith.constant 0 : i32
    %c0_i32_0 = arith.constant 0 : i32
    return %arg0, %c0_i32 : i32, i32
  }
}

</mosaic_0001>

<bundles_post_ra>
// kernel: tpu_custom_call.1
= control target key start
LH: loop header
LB: loop body
LE: loop exit
PB: predicated region body
PF: predicated region fallthrough
CT: control target
= control target key end

     0   :  { %10 = vsyncpa [#allocation3], 0  ;;  %s634_s0 = inlined_call_operand.vmem [shape: f32[16,256], index: 0, kind: input, shape index: {}]   ;;  %s635_s1 = inlined_call_operand.hbm [shape: f32[256,128], index: 1, kind: input, shape index: {}]   ;;  %s636_s2 = inlined_call_operand.vmem [shape: f32[1,128], index: 2, kind: input, shape index: {}]   ;;  %s637_s3 = inlined_call_operand.vmem [shape: f32[128,64], index: 3, kind: input, shape index: {}]   ;;  %s638_s4 = inlined_call_operand.vmem [shape: f32[1,64], index: 4, kind: input, shape index: {}]   ;;  %s639_s5 = inlined_call_operand.hbm [shape: f32[16,64], index: 5, kind: output, shape index: {}]  }
   0x1   :  { %11 = vsyncpa [#allocation4], 0  ;;  %s504_s18 = smov [#allocation2]   ;;  %s456_s22 = scalar_lea.hbm %s635_s1, 4096 }
   0x2   :  { %s19_s19 = sshll.u32 %s504_s18, 4  ;;  %p457_p0 = scmp.ne.s32.totalorder %s635_s1, %s456_s22  ;;  %s20_s19 = int_to_ptr.vmem [resolvable:$true] %s19_s19 }
   0x3   :  { %p460_p1 = scmp.lt.u32.totalorder %s456_s22, %s635_s1 }
   0x5   :  { %p462_p2 = pnand %p460_p1, %p457_p0 }
   0x7   :  { %465 = shalt.err (!%p462_p2)
}
   0x8   :  { %s466_s27 = scalar_lea.vmem %s20_s19, 4096  ;;  %p471_p4 = scmp.lt.s32.totalorder %s20_s19, %s20_s19 }
   0x9   :  { %p467_p3 = scmp.ne.s32.totalorder %s20_s19, %s466_s27  ;;  %p472_p5 = scmp.lt.s32.totalorder %s466_s27, %s466_s27 }
   0xb   :  { %p473_p6 = por %p472_p5, %p471_p4 }
   0xd   :  { %p474_p7 = pnand %p473_p6, %p467_p3 }
   0xf   :  { %477 = shalt.err (!%p474_p7)
}
  0x10   :  { %s505_s28 = smov 128   ;;  %s506_s29 = smov 8  }
  0x11   :  { %25 = dma.hbm_to_vmem [thread:$0]  %s635_s1, 4096, %s20_s19, [#allocation3], %s505_s28, %s505_s28, %s506_s29  }
  0x12   :  { %500 = dma.done.wait [#allocation3], 4096  }
  0x13   :  { %501 = vsyncadd [#allocation3], 4294963200  ;;  %v67_v0 = vld [vmem:[#allocation2 + $0x80] sm:$0xff]  ;;  %v68_v1 = vld [vmem:[#allocation2 + $0x88] sm:$0xff]  ;;  %s507_s24 = smov [#allocation5]   ;;  %vm267_vm0 = vcmask 523264  }
  0x14   :  { %v51_v2 = vld [vmem:[#allocation2] sm:$0xff]  ;;  %v380_v3 = vpack.c.bf16 %v68_v1, %v67_v0  ;;  %v52_v4 = vld [vmem:[#allocation2 + $0x8] sm:$0xff]  ;;  %v69_v5 = vld [vmem:[#allocation2 + $0x90] sm:$0xff]  ;;  %s275_s25 = sshll.u32 %s507_s24, 4  ;;  %s276_s25 = int_to_ptr.vmem [resolvable:$true] %s275_s25 }
  0x15   :  { %v70_v6 = vld [vmem:[#allocation2 + $0x98] sm:$0xff]  ;;  %v382_v7 = vpack.c.bf16 %v52_v4, %v51_v2  ;;  %v53_v9 = vld [vmem:[#allocation2 + $0x10] sm:$0xff]  ;;  %v71_v11 = vld [vmem:[#allocation2 + $0xa0] sm:$0xff]  ;;  %p483_p9 = scmp.lt.s32.totalorder %s276_s25, %s276_s25 }
  0x16   :  { %v384_v8 = vpack.c.bf16 %v70_v6, %v69_v5  ;;  %v54_v10 = vld [vmem:[#allocation2 + $0x18] sm:$0xff]  ;;  %381 = vmatprep.subr.bf16.mxu0 %v380_v3  ;;  %v72_v12 = vld [vmem:[#allocation2 + $0xa8] sm:$0xff]  ;;  %v55_v15 = vld [vmem:[#allocation2 + $0x20] sm:$0xff] }
  0x17   :  { %383 = vmatpush3.bf16.msra.mxu0 %v382_v7  ;;  %v386_v13 = vpack.c.bf16 %v54_v10, %v53_v9  ;;  %v388_v14 = vpack.c.bf16 %v72_v12, %v71_v11  ;;  %v56_v16 = vld [vmem:[#allocation2 + $0x28] sm:$0xff]  ;;  %v73_v17 = vld [vmem:[#allocation2 + $0xb0] sm:$0xff]  ;;  %v74_v18 = vld [vmem:[#allocation2 + $0xb8] sm:$0xff] }
  0x18   :  { %385 = vmatprep.subr.bf16.mxu0 %v384_v8  ;;  %v390_v19 = vpack.c.bf16 %v56_v16, %v55_v15  ;;  %v392_v20 = vpack.c.bf16 %v74_v18, %v73_v17  ;;  %v57_v21 = vld [vmem:[#allocation2 + $0x30] sm:$0xff]  ;;  %v58_v22 = vld [vmem:[#allocation2 + $0x38] sm:$0xff]  ;;  %v75_v23 = vld [vmem:[#allocation2 + $0xc0] sm:$0xff] }
  0x19   :  { %v76_v24 = vld [vmem:[#allocation2 + $0xc8] sm:$0xff]  ;;  %v59_v26 = vld [vmem:[#allocation2 + $0x40] sm:$0xff]  ;;  %v394_v28 = vpack.c.bf16 %v58_v22, %v57_v21  ;;  %v85_v31 = vld [vmem:[%s637_s3 + $0x10] sm:$0xff] }
  0x1a   :  { %v36_v25 = vld [vmem:[%s634_s0 + $0x8] sm:$0xff]  ;;  %v83_v29 = vld [vmem:[%s637_s3] sm:$0xff]  ;;  %v396_v32 = vpack.c.bf16 %v76_v24, %v75_v23  ;;  %v77_v34 = vld [vmem:[#allocation2 + $0xd0] sm:$0xff] }
  0x1b   :  { %387 = vmatpush3.bf16.msra.mxu0 %v386_v13  ;;  %v40_v27 = vadd.f32 1.0, %v36_v25  ;;  %v84_v30 = vld [vmem:[%s637_s3 + $0x8] sm:$0xff]  ;;  %v86_v36 = vld [vmem:[%s637_s3 + $0x18] sm:$0xff]  ;;  %v87_v39 = vld [vmem:[%s637_s3 + $0x20] sm:$0xff] }
  0x1c   :  { %389 = vmatprep.subr.bf16.mxu0 %v388_v14  ;;  %v60_v33 = vld [vmem:[#allocation2 + $0x48] sm:$0xff]  ;;  %v412_v35 = vpack.c.bf16 %v84_v30, %v83_v29  ;;  %v78_v37 = vld [vmem:[#allocation2 + $0xd8] sm:$0xff]  ;;  %v416_v38 = vpack.c.bf16 %v86_v36, %v85_v31  ;;  %v35_v41 = vld [vmem:[%s634_s0] sm:$0xff] }
  0x1d   :  { %448 = vrcp.f32 %v40_v27  ;;  %v88_v40 = vld [vmem:[%s637_s3 + $0x28] sm:$0xff]  ;;  %v398_v42 = vpack.c.bf16 %v60_v33, %v59_v26  ;;  %v38_v43 = vld [vmem:[%s634_s0 + $0x18] sm:$0xff]  ;;  %v400_v44 = vpack.c.bf16 %v78_v37, %v77_v34  ;;  %v61_v45 = vld [vmem:[#allocation2 + $0x50] sm:$0xff]  ;;  %v39_v50 = vadd.f32 1.0, %v35_v41 }
  0x1e   :  { %413 = vmatprep.subr.bf16.mxu1 %v412_v35  ;;  %v62_v46 = vld [vmem:[#allocation2 + $0x58] sm:$0xff]  ;;  %v420_v47 = vpack.c.bf16 %v88_v40, %v87_v39  ;;  %v79_v48 = vld [vmem:[#allocation2 + $0xe0] sm:$0xff]  ;;  %v80_v49 = vld [vmem:[#allocation2 + $0xe8] sm:$0xff]  ;;  %v42_v51 = vadd.f32 1.0, %v38_v43 }
  0x1f   :  { %391 = vmatpush3.bf16.msra.mxu0 %v390_v19  ;;  %415 = vmatpush3.bf16.msra.mxu1 %v412_v35  ;;  %v37_v52 = vld [vmem:[%s634_s0 + $0x10] sm:$0xff]  ;;  %v90_v54 = vld [vmem:[%s637_s3 + $0x38] sm:$0xff]  ;;  %v402_v55 = vpack.c.bf16 %v62_v46, %v61_v45  ;;  %v404_v56 = vpack.c.bf16 %v80_v49, %v79_v48  ;;  %v63_v57 = vld [vmem:[#allocation2 + $0x60] sm:$0xff]  ;;  %450 = vrcp.f32 %v39_v50 }
  0x20   :  { %393 = vmatprep.subr.bf16.mxu0 %v392_v20  ;;  %417 = vmatprep.subr.bf16.mxu1 %v416_v38  ;;  %v89_v53 = vld [vmem:[%s637_s3 + $0x30] sm:$0xff]  ;;  %v64_v58 = vld [vmem:[#allocation2 + $0x68] sm:$0xff]  ;;  %v82_v60 = vld [vmem:[#allocation2 + $0xf8] sm:$0xff]  ;;  %v41_v61 = vadd.f32 1.0, %v37_v52  ;;  %452 = vrcp.f32 %v42_v51 }
  0x21   :  { %v81_v59 = vld [vmem:[#allocation2 + $0xf0] sm:$0xff]  ;;  %v424_v62 = vpack.c.bf16 %v90_v54, %v89_v53  ;;  %v91_v0 = vld [vmem:[%s637_s3 + $0x40] sm:$0xff]  ;;  %v92_v1 = vld [vmem:[%s637_s3 + $0x48] sm:$0xff]  ;;  %v406_v2 = vpack.c.bf16 %v64_v58, %v63_v57 }
  0x22   :  { %v408_v3 = vpack.c.bf16 %v82_v60, %v81_v59  ;;  %v65_v4 = vld [vmem:[#allocation2 + $0x70] sm:$0xff]  ;;  %v66_v5 = vld [vmem:[#allocation2 + $0x78] sm:$0xff]  ;;  %454 = vrcp.f32 %v41_v61  ;;  %v428_v6 = vpack.c.bf16 %v92_v1, %v91_v0  ;;  %v95_v14 = vld [vmem:[%s637_s3 + $0x60] sm:$0xff] }
  0x23   :  { %395 = vmatpush3.bf16.msra.mxu0 %v394_v28  ;;  %419 = vmatpush3.bf16.msra.mxu1 %v416_v38  ;;  %v410_v7 = vpack.c.bf16 %v66_v5, %v65_v4  ;;  %v93_v11 = vld [vmem:[%s637_s3 + $0x50] sm:$0xff]  ;;  %v94_v12 = vld [vmem:[%s637_s3 + $0x58] sm:$0xff]  ;;  %v96_v15 = vld [vmem:[%s637_s3 + $0x68] sm:$0xff] }
  0x24   :  { %397 = vmatprep.subr.bf16.mxu0 %v396_v32  ;;  %421 = vmatprep.subr.bf16.mxu1 %v420_v47  ;;  %v432_v13 = vpack.c.bf16 %v94_v12, %v93_v11  ;;  %v436_v16 = vpack.c.bf16 %v96_v15, %v95_v14  ;;  %v97_v17 = vld [vmem:[%s637_s3 + $0x70] sm:$0xff]  ;;  %v98_v18 = vld [vmem:[%s637_s3 + $0x78] sm:$0xff]  ;;  %v287_v22 = vld [vmem:[%s636_s2] ss:$0 sm:$0xff]  ;;  %s478_s2 = scalar_lea.vmem %s276_s25, 256 }
  0x25   :  { %v440_v19 = vpack.c.bf16 %v98_v18, %v97_v17  ;;  %v288_v31 = vld [vmem:[%s638_s4] ss:$0 sm:$0xff]  ;;  %p479_p8 = scmp.ne.s32.totalorder %s276_s25, %s478_s2  ;;  %p484_p10 = scmp.lt.s32.totalorder %s478_s2, %s478_s2 }
  0x27   :  { %399 = vmatpush3.bf16.msra.mxu0 %v398_v42  ;;  %v449_v63 = vpop.eup %448  ;;  %423 = vmatpush3.bf16.msra.mxu1 %v420_v47  ;;  %p485_p11 = por %p484_p10, %p483_p9 }
  0x28   :  { %401 = vmatprep.subr.bf16.mxu0 %v400_v44  ;;  %170 = vmatprep.mubr.f32.mxu0 %v449_v63 }
  0x29   :  { %425 = vmatprep.subr.bf16.mxu1 %v424_v62  ;;  %v451_v8 = vpop.eup %450  ;;  %p486_p12 = pnand %p485_p11, %p479_p8 }
  0x2a   :  { %v453_v9 = vpop.eup %452 }
  0x2b   :  { %403 = vmatpush3.bf16.msra.mxu0 %v402_v55  ;;  %427 = vmatpush3.bf16.msra.mxu1 %v424_v62 }
  0x2c   :  { %405 = vmatprep.subr.bf16.mxu0 %v404_v56  ;;  %429 = vmatprep.subr.bf16.mxu1 %v428_v6  ;;  %v455_v10 = vpop.eup %454 }
  0x2f   :  { %407 = vmatpush3.bf16.msra.mxu0 %v406_v2  ;;  %431 = vmatpush3.bf16.msra.mxu1 %v428_v6 }
  0x30   :  { %409 = vmatprep.subr.bf16.mxu0 %v408_v3  ;;  %433 = vmatprep.subr.bf16.mxu1 %v432_v13 }
  0x33   :  { %411 = vmatpush3.bf16.msra.mxu0 %v410_v7  ;;  %435 = vmatpush3.bf16.msra.mxu1 %v432_v13 }
  0x34   :  { %437 = vmatprep.subr.bf16.mxu1 %v436_v16 }
  0x36   :  { %171 = vmatmul.mubr.f32.vlgmr.msra.gmra.mrb[0].mxu0 %v451_v8 }
  0x37   :  { %175 = vmatprep.mubr.f32.mxu0 %v453_v9  ;;  %439 = vmatpush3.bf16.msra.mxu1 %v436_v16 }
  0x38   :  { %441 = vmatprep.subr.bf16.mxu1 %v440_v19 }
  0x3a   :  { %176 = vmatmul.mubr.f32.gmra.mrb[2].mxu0 %v455_v10 }
  0x3b   :  { %443 = vmatpush3.bf16.msra.mxu1 %v440_v19 }
 0x109   :  { %v321_v20 = vpop.f32.mrb[0].mxu0 }
 0x10a   :  { %v322_v21 = vpop.f32.mrb[1].mxu0 }
 0x10b   :  { %v323_v23 = vadd.f32 %v322_v21, %v321_v20 }
 0x10d   :  { %v324_v24 = vpop.f32.mrb[2].mxu0  ;;  %v173_v25 = vadd.f32 %v323_v23, %v287_v22 }
 0x10e   :  { %v325_v26 = vpop.f32.mrb[3].mxu0 }
 0x10f   :  { %v326_v27 = vadd.f32 %v325_v26, %v324_v24  ;;  %v181_v28 = vmax.f32 %v173_v25, 0.0 }
 0x111   :  { %v178_v29 = vadd.f32 %v326_v27, %v287_v22  ;;  %377 = vmatprep.mubr.f32.mxu1 %v181_v28 }
 0x113   :  { %v182_v30 = vmax.f32 %v178_v29, 0.0 }
 0x115   :  { %378 = vmatmul.mubr.f32.vlgmr.msra.gmra.mrb[0].mxu1 %v182_v30 }
 0x1e8   :  { %v379_v32 = vpop.f32.mrb[0].mxu1 }
 0x1e9   :  { %v262_v33 = vadd.f32 %v379_v32, %v288_v31  ;;  %v256_v34 = vpop.f32.mrb[1].mxu1 }
 0x1ea   :  { %v257_v35 = vadd.f32 %v288_v31, %v256_v34 }
 0x1eb   :  { %v266_v36 = vmax.f32 %v262_v33, 0.0 }
 0x1ec   :  { %v265_v37 = vmax.f32 %v257_v35, 0.0 }
 0x1ed   :  { %269 = vst.msk [vmem:[#allocation5 + $0x8] sm:$0xff] %vm267_vm0, %v266_v36 }
 0x1ee   :  { %268 = vst.msk [vmem:[#allocation5] sm:$0xff] %vm267_vm0, %v265_v37 }
 0x1ef   :  { %489 = shalt.err (!%p486_p12)
}
 0x1f0   :  { %s490_s27 = scalar_lea.hbm %s639_s5, 256 }
 0x1f1   :  { %p491_p13 = scmp.ne.s32.totalorder %s639_s5, %s490_s27  ;;  %p494_p0 = scmp.lt.u32.totalorder %s490_s27, %s639_s5 }
 0x1f3   :  { %p496_p1 = pnand %p494_p0, %p491_p13 }
 0x1f5   :  { %499 = shalt.err (!%p496_p1)
}
 0x1f6   :  { %281 = dma.vmem_to_hbm [thread:$0]  %s276_s25, 256, %s639_s5, [#allocation4], %s505_s28, %s505_s28, %s506_s29  }
 0x1f7   :  { %502 = dma.done.wait [#allocation4], 256  }
 0x1f8   :  { %503 = vsyncadd [#allocation4], 4294967040 }
 0x1f9   :  { %285 = vsyncpa [#allocation3], 1 }
 0x1fa   :  { %286 = vsyncpa [#allocation4], 1 }

</bundles_post_ra>
